<compile_context>
chip_gen: v7x
topology: tpu7x:2x2x1
jax: 0.10.0
libtpu: 0.0.40
codegen_flags: <defaults>
</compile_context>

<pallas_src>
import functools

import jax
import jax.numpy as jnp
from jax import lax
from jax.experimental import pallas as pl
from jax.experimental.pallas import tpu as pltpu


def _transformed_kernel(x_ref, g_ref, b_ref, o_ref, *, eps: float):
    # Block is (TB, S, F): TB batch rows, full (S, F) slab per row.
    # torch dim=1 reduction -> axis=1 (sublane-mapped seq axis).
    xf = x_ref[...].astype(jnp.float32)
    s = xf.shape[1]
    inv_s = 1.0 / s
    # torch.var(dim=1) is unbiased (divides by S-1); S == 1 degenerates to
    # nan (0 * inf), same as torch.
    inv_sm1 = float("inf") if s == 1 else 1.0 / (s - 1)

    mean = jnp.sum(xf, axis=1, keepdims=True) * inv_s          # (TB, 1, F)
    xc = xf - mean
    var = jnp.sum(xc * xc, axis=1, keepdims=True) * inv_sm1    # (TB, 1, F)
    r = lax.rsqrt(var + eps)                                   # EUP rsqrt
    # x - mean*r == xc + mean*(1 - r): reuse the centered tensor instead of
    # materializing a second full-tile subtraction.
    xm = xc + mean * (1.0 - r)
    o_ref[...] = (g_ref[...] * xm + b_ref[...]).astype(o_ref.dtype)


def _is_dual_core_chip() -> bool:
    """True only for dual-TensorCore chips (v7x)."""
    try:
        kind = jax.devices()[0].device_kind.lower()
    except Exception:
        return False
    return "v7" in kind


def _choose_tb(B: int, S: int, F: int, itemsize: int, *, two_cores: bool) -> int:
    """How many batch rows to process per grid step (need not divide B)."""
    tile_row_bytes = S * F * itemsize
    # Budget: 4 arrays x 2 pipeline buffers + ~3 tile-sized elementwise
    # temporaries (cast/xc/out chain) => ~11x tile must fit the scoped VMEM
    # we request below (32 MiB on v7x, 64 MiB on v5e/v6e) with headroom.
    vmem_budget = (24 if two_cores else 48) * 1024 * 1024
    max_tb_vmem = max(1, vmem_budget // (11 * tile_row_bytes))
    # Bandwidth target: >= ~1 MiB/array tile is at the HBM roofline plateau;
    # use 2 MiB where VMEM is plentiful (v5e/v6e).
    target_bytes = (1 if two_cores else 2) * 1024 * 1024
    target_tb = max(1, target_bytes // tile_row_bytes)
    tb = min(max_tb_vmem, target_tb, B)
    # Only force >= 2 grid steps on dual-TC chips, and only if each tile
    # stays >= ~512 KiB after the split.
    if two_cores and B >= 2:
        half = max(1, B // 2)
        if half * tile_row_bytes >= 512 * 1024:
            tb = min(tb, half)
    return max(1, tb)


def _normalize_param(p: jax.Array, B: int, S: int, F: int, name: str):
    """Returns (param as 3-D array, is_batch_broadcast)."""
    if p.shape == (B, S, F):
        return p, False
    if p.shape == (1, S, F):
        return p, True
    if p.shape == (S, F):
        return p.reshape(1, S, F), True
    raise ValueError(f"{name} shape {p.shape} not broadcastable to {(B, S, F)}")


def transformed(data_x: jax.Array, gamma: jax.Array, beta: jax.Array,
                eps: float = 0.0) -> jax.Array:
    """Pallas version of Time_Series_Tokenization.transformed.

    data_x: (B, S, F).  gamma/beta: (B, S, F) (as in the PyTorch spec) or
    batch-broadcast (1, S, F) / (S, F), in which case they stay VMEM-resident.
    eps defaults to 0, so a zero-variance feature gives inf/nan exactly like
    the PyTorch mean/sqrt(0) reference (intentional).
    """
    B, S, F = data_x.shape
    gamma, g_bcast = _normalize_param(gamma, B, S, F, "gamma")
    beta, b_bcast = _normalize_param(beta, B, S, F, "beta")

    # Keep the output store lane-dense: pad the feature dim to a multiple of
    # 128 and slice afterwards.  Padded columns compute garbage independently
    # per feature and never touch the valid columns.
    pad_f = (-F) % 128
    if pad_f:
        padw = ((0, 0), (0, 0), (0, pad_f))
        data_x = jnp.pad(data_x, padw)
        gamma = jnp.pad(gamma, padw)
        beta = jnp.pad(beta, padw)
    Fp = F + pad_f

    # TODO(synk): if a single (S, Fp) row slab is too big for VMEM (very large
    # S), split S onto a second 'arbitrary' grid axis with sum / sum-of-squares
    # accumulators and a second elementwise pass.  Not needed at these shapes.
    two_cores = _is_dual_core_chip()
    tb = _choose_tb(B, S, Fp, data_x.dtype.itemsize, two_cores=two_cores)

    kernel = functools.partial(_transformed_kernel, eps=eps)
    x_spec = pl.BlockSpec((tb, S, Fp), lambda i: (i, 0, 0))

    def param_spec(bcast: bool) -> pl.BlockSpec:
        if bcast:
            # Same block for every grid step -> DMA'd once, VMEM-resident.
            return pl.BlockSpec((1, S, Fp), lambda i: (0, 0, 0))
        return pl.BlockSpec((tb, S, Fp), lambda i: (i, 0, 0))

    out = pl.pallas_call(
        kernel,
        out_shape=jax.ShapeDtypeStruct((B, S, Fp), data_x.dtype),
        grid=(pl.cdiv(B, tb),),            # ragged last block is masked on store
        in_specs=[x_spec, param_spec(g_bcast), param_spec(b_bcast)],
        out_specs=x_spec,
        compiler_params=pltpu.CompilerParams(
            dimension_semantics=("parallel",),
            vmem_limit_bytes=(32 if two_cores else 64) * 1024 * 1024),
    )(data_x, gamma, beta)

    if pad_f:
        out = out[..., :F]
    return out


def _transformed_ref(x, gamma, beta, eps=0.0):
    # Pure-JAX reference matching the PyTorch semantics exactly.
    mean = jnp.mean(x, axis=1)
    var = jnp.var(x, axis=1, ddof=1)          # torch.var default: unbiased
    m = mean / jnp.sqrt(var + eps)
    m = m[:, None, :]
    return gamma * (x - m) + beta


def time_series_tokenization_forward(data_x, data_y, gamma, beta):
    """Mirrors Time_Series_Tokenization.forward: computes transformed(data_x),
    skips the (untranslatable) seasonal decomposition, and returns 0."""
    tx = transformed(data_x, gamma, beta, eps=0.0)
    # TODO(synk): season() -> statsmodels seasonal_decompose (trend/seasonal/
    # resid) has no Pallas/TPU equivalent; its outputs are discarded anyway.
    return 0, tx


if __name__ == "__main__":
    key = jax.random.PRNGKey(0)
    k_x, k_y, k_g, k_b, k_x2, k_g2, k_b2 = jax.random.split(key, 7)

    # Test 1: PyTorch-spec shapes — gamma/beta full (B, S, F), F lane-dense.
    B, S, F = 8, 16, 128
    data_x = jax.random.normal(k_x, (B, S, F), dtype=jnp.float32)
    data_y = jax.random.normal(k_y, (B, S, F), dtype=jnp.float32)
    gamma = jax.random.uniform(k_g, (B, S, F), dtype=jnp.float32)
    beta = jax.random.uniform(k_b, (B, S, F), dtype=jnp.float32)

    ret, tx = time_series_tokenization_forward(data_x, data_y, gamma, beta)
    tx = jax.block_until_ready(tx)
    ref = _transformed_ref(data_x, gamma, beta)
    assert ret == 0
    assert jnp.allclose(tx, ref, atol=1e-4, rtol=1e-4), "mismatch (test 1)"

    # Test 2: exercises the new paths — ragged cdiv grid (B not a multiple of
    # tb), VMEM-resident broadcast gamma/beta, and F padded up to 128.
    B2, S2, F2 = 300, 16, 96
    x2 = jax.random.normal(k_x2, (B2, S2, F2), dtype=jnp.float32)
    g2 = jax.random.uniform(k_g2, (S2, F2), dtype=jnp.float32)
    b2 = jax.random.uniform(k_b2, (S2, F2), dtype=jnp.float32)
    tx2 = jax.block_until_ready(transformed(x2, g2, b2, eps=0.0))
    ref2 = _transformed_ref(x2, g2, b2)
    assert jnp.allclose(tx2, ref2, atol=1e-4, rtol=1e-4), "mismatch (test 2)"

    print("KERNEL_OK")
</pallas_src>

<mosaic_0001>
module attributes {stable_mosaic.version = 11 : i64} {
  func.func @_transformed_kernel(%arg0: i32, %arg1: memref<8x16x128xf32, #tpu.memory_space<vmem>>, %arg2: memref<8x16x128xf32, #tpu.memory_space<vmem>>, %arg3: memref<8x16x128xf32, #tpu.memory_space<vmem>>, %arg4: memref<8x16x128xf32, #tpu.memory_space<vmem>>) attributes {dimension_semantics = [#tpu.dimension_semantics<parallel>], iteration_bounds = array<i64: 1>, scalar_prefetch = 0 : i64, scratch_operands = 0 : i64, tpu.core_type = #tpu.core_type<tc>, window_params = [{transform_indices = @transform_0, window_bounds = array<i64: 8, 16, 128>}, {transform_indices = @transform_1, window_bounds = array<i64: 8, 16, 128>}, {transform_indices = @transform_2, window_bounds = array<i64: 8, 16, 128>}, {transform_indices = @transform_3, window_bounds = array<i64: 8, 16, 128>}]} {
    %c0 = arith.constant 0 : index
    %c0_0 = arith.constant 0 : index
    %c0_1 = arith.constant 0 : index
    %0 = vector.load %arg1[%c0, %c0_0, %c0_1] : memref<8x16x128xf32, #tpu.memory_space<vmem>>, vector<8x16x128xf32>
    %cst = arith.constant dense<0.000000e+00> : vector<8x128xf32>
    %1 = vector.multi_reduction <add>, %0, %cst [1] : vector<8x16x128xf32> to vector<8x128xf32>
    %2 = vector.shape_cast %1 : vector<8x128xf32> to vector<8x1x128xf32>
    %cst_2 = arith.constant 6.250000e-02 : f32
    %3 = vector.broadcast %cst_2 : f32 to vector<8x1x128xf32>
    %4 = arith.mulf %2, %3 : vector<8x1x128xf32>
    %5 = vector.broadcast %4 : vector<8x1x128xf32> to vector<8x16x128xf32>
    %6 = arith.subf %0, %5 : vector<8x16x128xf32>
    %7 = arith.mulf %6, %6 : vector<8x16x128xf32>
    %cst_3 = arith.constant dense<0.000000e+00> : vector<8x128xf32>
    %8 = vector.multi_reduction <add>, %7, %cst_3 [1] : vector<8x16x128xf32> to vector<8x128xf32>
    %9 = vector.shape_cast %8 : vector<8x128xf32> to vector<8x1x128xf32>
    %cst_4 = arith.constant 0.0666666701 : f32
    %10 = vector.broadcast %cst_4 : f32 to vector<8x1x128xf32>
    %11 = arith.mulf %9, %10 : vector<8x1x128xf32>
    %cst_5 = arith.constant 0.000000e+00 : f32
    %12 = vector.broadcast %cst_5 : f32 to vector<8x1x128xf32>
    %13 = arith.addf %11, %12 : vector<8x1x128xf32>
    %14 = math.rsqrt %13 : vector<8x1x128xf32>
    %cst_6 = arith.constant 1.000000e+00 : f32
    %15 = vector.broadcast %cst_6 : f32 to vector<8x1x128xf32>
    %16 = arith.subf %15, %14 : vector<8x1x128xf32>
    %17 = arith.mulf %4, %16 : vector<8x1x128xf32>
    %18 = vector.broadcast %17 : vector<8x1x128xf32> to vector<8x16x128xf32>
    %19 = arith.addf %6, %18 : vector<8x16x128xf32>
    %c0_7 = arith.constant 0 : index
    %c0_8 = arith.constant 0 : index
    %c0_9 = arith.constant 0 : index
    %20 = vector.load %arg2[%c0_7, %c0_8, %c0_9] : memref<8x16x128xf32, #tpu.memory_space<vmem>>, vector<8x16x128xf32>
    %21 = arith.mulf %20, %19 : vector<8x16x128xf32>
    %c0_10 = arith.constant 0 : index
    %c0_11 = arith.constant 0 : index
    %c0_12 = arith.constant 0 : index
    %22 = vector.load %arg3[%c0_10, %c0_11, %c0_12] : memref<8x16x128xf32, #tpu.memory_space<vmem>>, vector<8x16x128xf32>
    %23 = arith.addf %21, %22 : vector<8x16x128xf32>
    %c0_13 = arith.constant 0 : index
    %c0_14 = arith.constant 0 : index
    %c0_15 = arith.constant 0 : index
    %24 = vector.load %arg4[%c0_13, %c0_14, %c0_15] : memref<8x16x128xf32, #tpu.memory_space<vmem>>, vector<8x16x128xf32>
    tpu.vector_store %arg4[%c0_13, %c0_14, %c0_15], %23 {strides = array<i32>} : memref<8x16x128xf32, #tpu.memory_space<vmem>>, vector<8x16x128xf32>,
    return
  }
  func.func @transform_0(%arg0: i32) -> (i32, i32, i32) {
    %c0_i32 = arith.constant 0 : i32
    %c0_i32_0 = arith.constant 0 : i32
    %c0_i32_1 = arith.constant 0 : i32
    return %arg0, %c0_i32, %c0_i32_0 : i32, i32, i32
  }
  func.func @transform_1(%arg0: i32) -> (i32, i32, i32) {
    %c0_i32 = arith.constant 0 : i32
    %c0_i32_0 = arith.constant 0 : i32
    %c0_i32_1 = arith.constant 0 : i32
    return %arg0, %c0_i32, %c0_i32_0 : i32, i32, i32
  }
  func.func @transform_2(%arg0: i32) -> (i32, i32, i32) {
    %c0_i32 = arith.constant 0 : i32
    %c0_i32_0 = arith.constant 0 : i32
    %c0_i32_1 = arith.constant 0 : i32
    return %arg0, %c0_i32, %c0_i32_0 : i32, i32, i32
  }
  func.func @transform_3(%arg0: i32) -> (i32, i32, i32) {
    %c0_i32 = arith.constant 0 : i32
    %c0_i32_0 = arith.constant 0 : i32
    %c0_i32_1 = arith.constant 0 : i32
    return %arg0, %c0_i32, %c0_i32_0 : i32, i32, i32
  }
}

</mosaic_0001>

<bundles_post_ra>
// kernel: tpu_custom_call.1
= control target key start
LH: loop header
LB: loop body
LE: loop exit
PB: predicated region body
PF: predicated region fallthrough
CT: control target
= control target key end

     0   :  { %8 = vsyncpa [#allocation3], 0  ;;  %s759_s0 = inlined_call_operand.hbm [shape: f32[8,16,128], index: 0, kind: input, shape index: {}]   ;;  %s760_s1 = inlined_call_operand.hbm [shape: f32[8,16,128], index: 1, kind: input, shape index: {}]   ;;  %s761_s2 = inlined_call_operand.hbm [shape: f32[8,16,128], index: 2, kind: input, shape index: {}]   ;;  %s762_s3 = inlined_call_operand.hbm [shape: f32[8,16,128], index: 3, kind: output, shape index: {}]  }
   0x1   :  { %9 = vsyncpa [#allocation6], 0 }
   0x2   :  { %10 = vsyncpa [#allocation4], 0  ;;  %s494_s12 = smov [#allocation5]   ;;  %s495_s14 = smov [#allocation2]  }
   0x3   :  { %s28_s13 = sshll.u32 %s494_s12, 4  ;;  %s16_s15 = sshll.u32 %s495_s14, 4  ;;  %s29_s13 = int_to_ptr.vmem [resolvable:$true] %s28_s13  ;;  %s520_s15 = int_to_ptr.vmem [resolvable:$true] %s16_s15 }
   0x4   :  { %s400_s18 = scalar_lea.hbm %s760_s1, 2048 }
   0x5   :  { %p401_p0 = scmp.ne.s32.totalorder %s760_s1, %s400_s18  ;;  %p404_p1 = scmp.lt.u32.totalorder %s400_s18, %s760_s1 }
   0x7   :  { %p406_p2 = pnand %p404_p1, %p401_p0 }
   0x9   :  { %409 = shalt.err (!%p406_p2)
}
   0xa   :  { %s410_s23 = scalar_lea.vmem %s29_s13, 2048  ;;  %p415_p4 = scmp.lt.s32.totalorder %s29_s13, %s29_s13 }
   0xb   :  { %p411_p3 = scmp.ne.s32.totalorder %s29_s13, %s410_s23  ;;  %p416_p5 = scmp.lt.s32.totalorder %s410_s23, %s410_s23 }
   0xd   :  { %p417_p6 = por %p416_p5, %p415_p4 }
   0xf   :  { %p418_p7 = pnand %p417_p6, %p411_p3 }
  0x11   :  { %421 = shalt.err (!%p418_p7)
}
  0x12   :  { %s496_s24 = smov 128   ;;  %s497_s25 = smov 8  }
  0x13   :  { %34 = dma.hbm_to_vmem [thread:$0]  %s760_s1, 2048, %s29_s13, [#allocation6], %s496_s24, %s496_s24, %s497_s25  }
  0x14   :  { %s422_s30 = scalar_lea.hbm %s759_s0, 2048 }
  0x15   :  { %p423_p8 = scmp.ne.s32.totalorder %s759_s0, %s422_s30  ;;  %p426_p9 = scmp.lt.u32.totalorder %s422_s30, %s759_s0 }
  0x17   :  { %p428_p10 = pnand %p426_p9, %p423_p8 }
  0x19   :  { %431 = shalt.err (!%p428_p10)
}
  0x1a   :  { %s432_s8 = scalar_lea.vmem %s520_s15, 2048  ;;  %p437_p12 = scmp.lt.s32.totalorder %s520_s15, %s520_s15 }
  0x1b   :  { %p433_p11 = scmp.ne.s32.totalorder %s520_s15, %s432_s8  ;;  %p438_p13 = scmp.lt.s32.totalorder %s432_s8, %s432_s8 }
  0x1d   :  { %p439_p0 = por %p438_p13, %p437_p12 }
  0x1f   :  { %p440_p1 = pnand %p439_p0, %p433_p11 }
  0x21   :  { %443 = shalt.err (!%p440_p1)
}
  0x22   :  { %22 = dma.hbm_to_vmem [thread:$0]  %s759_s0, 2048, %s520_s15, [#allocation3], %s496_s24, %s496_s24, %s497_s25  }
  0x23   :  { %s498_s10 = smov [#allocation7]   ;;  %s444_s14 = scalar_lea.hbm %s761_s2, 2048 }
  0x24   :  { %s40_s11 = sshll.u32 %s498_s10, 4  ;;  %p445_p2 = scmp.ne.s32.totalorder %s761_s2, %s444_s14  ;;  %s41_s11 = int_to_ptr.vmem [resolvable:$true] %s40_s11 }
  0x25   :  { %p448_p3 = scmp.lt.u32.totalorder %s444_s14, %s761_s2 }
  0x27   :  { %p450_p4 = pnand %p448_p3, %p445_p2 }
  0x29   :  { %453 = shalt.err (!%p450_p4)
}
  0x2a   :  { %s454_s20 = scalar_lea.vmem %s41_s11, 2048  ;;  %p459_p6 = scmp.lt.s32.totalorder %s41_s11, %s41_s11 }
  0x2b   :  { %p455_p5 = scmp.ne.s32.totalorder %s41_s11, %s454_s20  ;;  %p460_p7 = scmp.lt.s32.totalorder %s454_s20, %s454_s20 }
  0x2d   :  { %p461_p8 = por %p460_p7, %p459_p6 }
  0x2f   :  { %p462_p9 = pnand %p461_p8, %p455_p5 }
  0x31   :  { %465 = shalt.err (!%p462_p9)
}
  0x32   :  { %46 = dma.hbm_to_vmem [thread:$0]  %s761_s2, 2048, %s41_s11, [#allocation6], %s496_s24, %s496_s24, %s497_s25  }
  0x33   :  { %488 = dma.done.wait [#allocation3], 2048  }
  0x34   :  { %489 = vsyncadd [#allocation3], 4294965248 }
  0x35   :  { %490 = dma.done.wait [#allocation6], 4096  }
  0x36   :  { %491 = vsyncadd [#allocation6], 4294963200  ;;  %v56_v0 = vld [vmem:[#allocation2] sm:$0xff]  ;;  %v57_v1 = vld [vmem:[#allocation2 + $0x8] sm:$0xff]  ;;  %s499_s2 = smov [#allocation8]  }
  0x37   :  { %v72_v2 = vadd.f32 %v57_v1, %v56_v0  ;;  %v58_v3 = vld [vmem:[#allocation2 + $0x10] sm:$0xff]  ;;  %v59_v4 = vld [vmem:[#allocation2 + $0x18] sm:$0xff]  ;;  %v572_v7 = vld [vmem:[#allocation2 + $0x20] sm:$0xff]  ;;  %s365_s21 = sshll.u32 %s499_s2, 4  ;;  %s366_s21 = int_to_ptr.vmem [resolvable:$true] %s365_s21 }
  0x38   :  { %v79_v6 = vadd.f32 %v59_v4, %v58_v3  ;;  %v574_v8 = vld [vmem:[#allocation2 + $0x28] sm:$0xff]  ;;  %v578_v12 = vld [vmem:[#allocation2 + $0x30] sm:$0xff]  ;;  %v580_v13 = vld [vmem:[#allocation2 + $0x38] sm:$0xff]  ;;  %s466_s22 = scalar_lea.vmem %s366_s21, 2048  ;;  %p471_p11 = scmp.lt.s32.totalorder %s366_s21, %s366_s21 }
  0x39   :  { %v73_v5 = vrot.slane %v72_v2, 4  ;;  %v86_v11 = vadd.f32 %v574_v8, %v572_v7  ;;  %v93_v17 = vadd.f32 %v580_v13, %v578_v12  ;;  %v584_v18 = vld [vmem:[#allocation2 + $0x40] sm:$0xff]  ;;  %v586_v19 = vld [vmem:[#allocation2 + $0x48] sm:$0xff]  ;;  %v590_v25 = vld [vmem:[#allocation2 + $0x50] sm:$0xff]  ;;  %p467_p10 = scmp.ne.s32.totalorder %s366_s21, %s466_s22  ;;  %p472_p12 = scmp.lt.s32.totalorder %s466_s22, %s466_s22 }
  0x3a   :  { %v80_v10 = vrot.slane %v79_v6, 4  ;;  %v100_v24 = vadd.f32 %v586_v19, %v584_v18  ;;  %v592_v26 = vld [vmem:[#allocation2 + $0x58] sm:$0xff]  ;;  %v596_v33 = vld [vmem:[#allocation2 + $0x60] sm:$0xff]  ;;  %v598_v34 = vld [vmem:[#allocation2 + $0x68] sm:$0xff] }
  0x3b   :  { %v74_v9 = vadd.f32 %v73_v5, %v72_v2  ;;  %v87_v16 = vrot.slane %v86_v11, 4  ;;  %v94_v23 = vrot.slane %v93_v17, 4  ;;  %v107_v32 = vadd.f32 %v592_v26, %v590_v25  ;;  %v602_v42 = vld [vmem:[#allocation2 + $0x70] sm:$0xff]  ;;  %v604_v43 = vld [vmem:[#allocation2 + $0x78] sm:$0xff]  ;;  %p473_p13 = por %p472_p12, %p471_p11 }
  0x3c   :  { %v81_v15 = vadd.f32 %v80_v10, %v79_v6  ;;  %v101_v31 = vrot.slane %v100_v24, 4  ;;  %v114_v41 = vadd.f32 %v598_v34, %v596_v33  ;;  %v610_v51 = vadd.f32 %v604_v43, %v602_v42 }
  0x3d   :  { %v75_v14 = vrot.slane %v74_v9, 2  ;;  %v88_v22 = vadd.f32 %v87_v16, %v86_v11  ;;  %v95_v30 = vadd.f32 %v94_v23, %v93_v17  ;;  %v108_v40 = vrot.slane %v107_v32, 4  ;;  %p474_p0 = pnand %p473_p13, %p467_p10 }
  0x3e   :  { %v82_v21 = vrot.slane %v81_v15, 2  ;;  %v102_v39 = vadd.f32 %v101_v31, %v100_v24  ;;  %v115_v50 = vrot.slane %v114_v41, 4 }
  0x3f   :  { %v76_v20 = vadd.f32 %v75_v14, %v74_v9  ;;  %v89_v29 = vrot.slane %v88_v22, 2  ;;  %v96_v38 = vrot.slane %v95_v30, 2  ;;  %v109_v49 = vadd.f32 %v108_v40, %v107_v32 }
  0x40   :  { %v83_v28 = vadd.f32 %v82_v21, %v81_v15  ;;  %v103_v48 = vrot.slane %v102_v39, 2  ;;  %v116_v59 = vadd.f32 %v115_v50, %v114_v41 }
  0x41   :  { %v77_v27 = vrot.slane %v76_v20, 1  ;;  %v90_v37 = vadd.f32 %v89_v29, %v88_v22  ;;  %v97_v47 = vadd.f32 %v96_v38, %v95_v30  ;;  %v110_v58 = vrot.slane %v109_v49, 2 }
  0x42   :  { %v84_v36 = vrot.slane %v83_v28, 1  ;;  %v104_v57 = vadd.f32 %v103_v48, %v102_v39  ;;  %v117_v11 = vrot.slane %v116_v59, 2 }
  0x43   :  { %v78_v35 = vadd.f32 %v77_v27, %v76_v20  ;;  %v91_v46 = vrot.slane %v90_v37, 1  ;;  %v98_v56 = vrot.slane %v97_v47, 1  ;;  %v111_v5 = vadd.f32 %v110_v58, %v109_v49 }
  0x44   :  { %v85_v45 = vadd.f32 %v84_v36, %v83_v28  ;;  %v105_v2 = vrot.slane %v104_v57, 1  ;;  %v118_v21 = vadd.f32 %v117_v11, %v116_v59 }
  0x45   :  { %v606_v44 = vmul.f32 0.0625, %v78_v35  ;;  %v92_v55 = vadd.f32 %v91_v46, %v90_v37  ;;  %v112_v20 = vrot.slane %v111_v5, 1 }
  0x46   :  { %v618_v54 = vmul.f32 0.0625, %v85_v45  ;;  %v106_v15 = vadd.f32 %v105_v2, %v104_v57  ;;  %v119_v35 = vrot.slane %v118_v21, 1 }
  0x47   :  { %v613_v52 = vsub.f32 %v56_v0, %v606_v44  ;;  %v616_v53 = vsub.f32 %v57_v1, %v606_v44  ;;  %v630_v0 = vmul.f32 0.0625, %v92_v55  ;;  %v99_v1 = vadd.f32 %v98_v56, %v97_v47 }
  0x48   :  { %v625_v62 = vsub.f32 %v58_v3, %v618_v54  ;;  %v628_v63 = vsub.f32 %v59_v4, %v618_v54  ;;  %v658_v28 = vmul.f32 0.0625, %v106_v15  ;;  %v113_v29 = vadd.f32 %v112_v20, %v111_v5 }
  0x49   :  { %v152_v60 = vmul.f32 %v613_v52, %v613_v52  ;;  %v153_v61 = vmul.f32 %v616_v53, %v616_v53  ;;  %v638_v3 = vsub.f32 %v572_v7, %v630_v0  ;;  %v642_v4 = vsub.f32 %v574_v8, %v630_v0 }
  0x4a   :  { %v154_v9 = vmul.f32 %v625_v62, %v625_v62  ;;  %v155_v10 = vmul.f32 %v628_v63, %v628_v63  ;;  %v644_v14 = vmul.f32 0.0625, %v99_v1  ;;  %v666_v37 = vsub.f32 %v584_v18, %v658_v28 }
  0x4b   :  { %v168_v6 = vadd.f32 %v153_v61, %v152_v60  ;;  %v156_v22 = vmul.f32 %v638_v3, %v638_v3  ;;  %v157_v23 = vmul.f32 %v642_v4, %v642_v4  ;;  %v672_v40 = vmul.f32 0.0625, %v113_v29 }
  0x4c   :  { %v175_v17 = vadd.f32 %v155_v10, %v154_v9  ;;  %v652_v7 = vsub.f32 %v578_v12, %v644_v14  ;;  %v656_v8 = vsub.f32 %v580_v13, %v644_v14  ;;  %v670_v13 = vsub.f32 %v586_v19, %v658_v28 }
  0x4d   :  { %v169_v16 = vrot.slane %v168_v6, 4  ;;  %v182_v30 = vadd.f32 %v157_v23, %v156_v22  ;;  %v120_v41 = vadd.f32 %v119_v35, %v118_v21  ;;  %v160_v47 = vmul.f32 %v666_v37, %v666_v37 }
  0x4e   :  { %v176_v27 = vrot.slane %v175_v17, 4  ;;  %v158_v31 = vmul.f32 %v652_v7, %v652_v7  ;;  %v159_v32 = vmul.f32 %v656_v8, %v656_v8  ;;  %v161_v48 = vmul.f32 %v670_v13, %v670_v13 }
  0x4f   :  { %v170_v24 = vadd.f32 %v169_v16, %v168_v6  ;;  %v183_v38 = vrot.slane %v182_v30, 4  ;;  %v680_v50 = vsub.f32 %v590_v25, %v672_v40  ;;  %v684_v19 = vsub.f32 %v592_v26, %v672_v40 }
  0x50   :  { %v177_v12 = vadd.f32 %v176_v27, %v175_v17  ;;  %v189_v39 = vadd.f32 %v159_v32, %v158_v31  ;;  %v196_v57 = vadd.f32 %v161_v48, %v160_v47  ;;  %v686_v58 = vmul.f32 0.0625, %v120_v41 }
  0x51   :  { %v171_v36 = vrot.slane %v170_v24, 2  ;;  %v184_v49 = vadd.f32 %v183_v38, %v182_v30  ;;  %v162_v61 = vmul.f32 %v680_v50, %v680_v50  ;;  %v163_v1 = vmul.f32 %v684_v19, %v684_v19 }
  0x52   :  { %v178_v46 = vrot.slane %v177_v12, 2  ;;  %v190_v18 = vrot.slane %v189_v39, 4  ;;  %v197_v5 = vrot.slane %v196_v57, 4  ;;  %v694_v26 = vsub.f32 %v596_v33, %v686_v58 }
  0x53   :  { %v172_v45 = vadd.f32 %v171_v36, %v170_v24  ;;  %v185_v59 = vrot.slane %v184_v49, 2  ;;  %v203_v10 = vadd.f32 %v163_v1, %v162_v61  ;;  %v698_v11 = vsub.f32 %v598_v34, %v686_v58 }
  0x54   :  { %v179_v56 = vadd.f32 %v178_v46, %v177_v12  ;;  %v191_v60 = vadd.f32 %v190_v18, %v189_v39  ;;  %v198_v17 = vadd.f32 %v197_v5, %v196_v57  ;;  %v164_v20 = vmul.f32 %v694_v26, %v694_v26 }
  0x55   :  { %v173_v55 = vrot.slane %v172_v45, 1  ;;  %v186_v6 = vadd.f32 %v185_v59, %v184_v49  ;;  %v204_v23 = vrot.slane %v203_v10, 4  ;;  %v165_v33 = vmul.f32 %v698_v11, %v698_v11 }
  0x56   :  { %v180_v25 = vrot.slane %v179_v56, 1  ;;  %v192_v9 = vrot.slane %v191_v60, 2  ;;  %v199_v27 = vrot.slane %v198_v17, 2  ;;  %v122_v29 = vrot.slane %v610_v51, 4 }
  0x57   :  { %v174_v2 = vadd.f32 %v173_v55, %v172_v45  ;;  %v187_v21 = vrot.slane %v186_v6, 1  ;;  %v205_v31 = vadd.f32 %v204_v23, %v203_v10  ;;  %v210_v32 = vadd.f32 %v165_v33, %v164_v20  ;;  %v280_v20 = vld [vmem:[#allocation5] sm:$0xff] }
  0x58   :  { %v181_v16 = vadd.f32 %v180_v25, %v179_v56  ;;  %v193_v22 = vadd.f32 %v192_v9, %v191_v60  ;;  %v200_v35 = vadd.f32 %v199_v27, %v198_v17  ;;  %v123_v36 = vadd.f32 %v122_v29, %v610_v51  ;;  %v312_v27 = vld [vmem:[#allocation7] sm:$0xff] }
  0x59   :  { %v224_v15 = vmul.f32 0.06666667, %v174_v2  ;;  %v188_v30 = vadd.f32 %v187_v21, %v186_v6  ;;  %v206_v39 = vrot.slane %v205_v31, 2  ;;  %v211_v41 = vrot.slane %v210_v32, 4  ;;  %v281_v21 = vld [vmem:[#allocation5 + $0x8] sm:$0xff] }
  0x5a   :  { %v225_v24 = vmul.f32 0.06666667, %v181_v16  ;;  %v194_v34 = vrot.slane %v193_v22, 1  ;;  %v201_v45 = vrot.slane %v200_v35, 1  ;;  %v124_v46 = vrot.slane %v123_v36, 2 }
  0x5b   :  { %384 = vrsqrt.f32 %v224_v15  ;;  %v226_v12 = vmul.f32 0.06666667, %v188_v30  ;;  %v207_v48 = vadd.f32 %v206_v39, %v205_v31  ;;  %v212_v49 = vadd.f32 %v211_v41, %v210_v32  ;;  %v282_v31 = vld [vmem:[#allocation5 + $0x10] sm:$0xff]  ;;  %v283_v32 = vld [vmem:[#allocation5 + $0x18] sm:$0xff] }
  0x5c   :  { %386 = vrsqrt.f32 %v225_v24  ;;  %v195_v38 = vadd.f32 %v194_v34, %v193_v22  ;;  %v202_v18 = vadd.f32 %v201_v45, %v200_v35  ;;  %v125_v55 = vadd.f32 %v124_v46, %v123_v36  ;;  %v313_v34 = vld [vmem:[#allocation7 + $0x8] sm:$0xff]  ;;  %v314_v39 = vld [vmem:[#allocation7 + $0x10] sm:$0xff] }
  0x5d   :  { %388 = vrsqrt.f32 %v226_v12  ;;  %v208_v56 = vrot.slane %v207_v48, 1  ;;  %v213_v57 = vrot.slane %v212_v49, 2 }
  0x5e   :  { %v227_v47 = vmul.f32 0.06666667, %v195_v38  ;;  %v228_v59 = vmul.f32 0.06666667, %v202_v18  ;;  %v126_v60 = vrot.slane %v125_v55, 1 }
  0x5f   :  { %v209_v61 = vadd.f32 %v208_v56, %v207_v48  ;;  %v214_v1 = vadd.f32 %v213_v57, %v212_v49  ;;  %v285_v56 = vld [vmem:[#allocation5 + $0x28] sm:$0xff] }
  0x60   :  { %390 = vrsqrt.f32 %v227_v47  ;;  %v127_v2 = vadd.f32 %v126_v60, %v125_v55  ;;  %v284_v55 = vld [vmem:[#allocation5 + $0x20] sm:$0xff] }
  0x61   :  { %392 = vrsqrt.f32 %v228_v59  ;;  %v229_v5 = vmul.f32 0.06666667, %v209_v61  ;;  %v215_v6 = vrot.slane %v214_v1, 1  ;;  %v316_v60 = vld [vmem:[#allocation7 + $0x20] sm:$0xff] }
  0x62   :  { %v706_v10 = vmul.f32 0.0625, %v127_v2  ;;  %v286_v2 = vld [vmem:[#allocation5 + $0x30] sm:$0xff] }
  0x63   :  { %394 = vrsqrt.f32 %v229_v5  ;;  %v216_v17 = vadd.f32 %v215_v6, %v214_v1 }
  0x64   :  { %v711_v22 = vsub.f32 %v602_v42, %v706_v10  ;;  %v715_v23 = vsub.f32 %v604_v43, %v706_v10 }
  0x65   :  { %v385_v51 = vpop.eup %384  ;;  %v230_v30 = vmul.f32 0.06666667, %v216_v17 }
  0x66   :  { %v248_v25 = vsub.f32 1.0, %v385_v51  ;;  %v387_v9 = vpop.eup %386  ;;  %v166_v42 = vmul.f32 %v711_v22, %v711_v22  ;;  %v167_v43 = vmul.f32 %v715_v23, %v715_v23  ;;  %v317_v51 = vld [vmem:[#allocation7 + $0x28] sm:$0xff] }
  0x67   :  { %v249_v16 = vsub.f32 1.0, %v387_v9  ;;  %v389_v33 = vpop.eup %388  ;;  %396 = vrsqrt.f32 %v230_v30 }
  0x68   :  { %v256_v15 = vmul.f32 %v248_v25, %v606_v44  ;;  %v250_v35 = vsub.f32 1.0, %v389_v33  ;;  %v217_v46 = vadd.f32 %v167_v43, %v166_v42  ;;  %v287_v25 = vld [vmem:[#allocation5 + $0x38] sm:$0xff]  ;;  %v321_v42 = vld [vmem:[#allocation7 + $0x48] sm:$0xff] }
  0x69   :  { %v257_v44 = vmul.f32 %v249_v16, %v618_v54  ;;  %v315_v54 = vld [vmem:[#allocation7 + $0x18] sm:$0xff] }
  0x6a   :  { %v264_v24 = vadd.f32 %v256_v15, %v613_v52  ;;  %v265_v29 = vadd.f32 %v256_v15, %v616_v53  ;;  %v391_v36 = vpop.eup %390  ;;  %v258_v41 = vmul.f32 %v250_v35, %v630_v0  ;;  %v218_v61 = vrot.slane %v217_v46, 4  ;;  %v320_v35 = vld [vmem:[#allocation7 + $0x40] sm:$0xff] }
  0x6b   :  { %v266_v52 = vadd.f32 %v257_v44, %v625_v62  ;;  %v267_v53 = vadd.f32 %v257_v44, %v628_v63  ;;  %v251_v45 = vsub.f32 1.0, %v391_v36  ;;  %v393_v57 = vpop.eup %392  ;;  %v289_v44 = vld [vmem:[#allocation5 + $0x48] sm:$0xff] }
  0x6c   :  { %v296_v12 = vmul.f32 %v280_v20, %v264_v24  ;;  %v297_v38 = vmul.f32 %v281_v21, %v265_v29  ;;  %v268_v59 = vadd.f32 %v258_v41, %v638_v3  ;;  %v269_v62 = vadd.f32 %v258_v41, %v642_v4  ;;  %v318_v4 = vld [vmem:[#allocation7 + $0x30] sm:$0xff]  ;;  %v288_v29 = vld [vmem:[#allocation5 + $0x40] sm:$0xff] }
  0x6d   :  { %v298_v49 = vmul.f32 %v282_v31, %v266_v52  ;;  %v299_v18 = vmul.f32 %v283_v32, %v267_v53  ;;  %v259_v63 = vmul.f32 %v251_v45, %v644_v14  ;;  %v252_v5 = vsub.f32 1.0, %v393_v57  ;;  %v395_v16 = vpop.eup %394  ;;  %v319_v14 = vld [vmem:[#allocation7 + $0x38] sm:$0xff]  ;;  %v290_v52 = vld [vmem:[#allocation5 + $0x50] sm:$0xff]  ;;  %v292_v57 = vld [vmem:[#allocation5 + $0x60] sm:$0xff] }
  0x6e   :  { %v328_v47 = vadd.f32 %v312_v27, %v296_v12  ;;  %v329_v48 = vadd.f32 %v313_v34, %v297_v38  ;;  %v300_v6 = vmul.f32 %v284_v55, %v268_v59  ;;  %v301_v9 = vmul.f32 %v285_v56, %v269_v62  ;;  %v322_v41 = vld [vmem:[#allocation7 + $0x50] sm:$0xff]  ;;  %v323_v45 = vld [vmem:[#allocation7 + $0x58] sm:$0xff]  ;;  %v293_v59 = vld [vmem:[#allocation5 + $0x68] sm:$0xff] }
  0x6f   :  { %v330_v0 = vadd.f32 %v314_v39, %v298_v49  ;;  %v331_v1 = vadd.f32 %v315_v54, %v299_v18  ;;  %v270_v15 = vadd.f32 %v259_v63, %v652_v7  ;;  %v271_v3 = vadd.f32 %v259_v63, %v656_v8  ;;  %v324_v62 = vld [vmem:[#allocation7 + $0x60] sm:$0xff]  ;;  %v325_v63 = vld [vmem:[#allocation7 + $0x68] sm:$0xff] }
  0x70   :  { %344 = vst [vmem:[#allocation8] sm:$0xff] %v328_v47  ;;  %345 = vst [vmem:[#allocation8 + $0x8] sm:$0xff] %v329_v48  ;;  %v260_v17 = vmul.f32 %v252_v5, %v658_v28  ;;  %v219_v20 = vadd.f32 %v218_v61, %v217_v46  ;;  %v332_v21 = vadd.f32 %v316_v60, %v300_v6  ;;  %v253_v34 = vsub.f32 1.0, %v395_v16  ;;  %v294_v5 = vld [vmem:[#allocation5 + $0x70] sm:$0xff] }
  0x71   :  { %346 = vst [vmem:[#allocation8 + $0x10] sm:$0xff] %v330_v0  ;;  %347 = vst [vmem:[#allocation8 + $0x18] sm:$0xff] %v331_v1  ;;  %v333_v33 = vadd.f32 %v317_v51, %v301_v9  ;;  %v302_v24 = vmul.f32 %v286_v2, %v270_v15  ;;  %v303_v27 = vmul.f32 %v287_v25, %v271_v3  ;;  %v397_v38 = vpop.eup %396  ;;  %v326_v9 = vld [vmem:[#allocation7 + $0x70] sm:$0xff]  ;;  %v327_v15 = vld [vmem:[#allocation7 + $0x78] sm:$0xff] }
  0x72   :  { %v272_v30 = vadd.f32 %v260_v17, %v666_v37  ;;  %v273_v7 = vadd.f32 %v260_v17, %v670_v13  ;;  %v220_v8 = vrot.slane %v219_v20, 2  ;;  %348 = vst [vmem:[#allocation8 + $0x20] sm:$0xff] %v332_v21  ;;  %v261_v36 = vmul.f32 %v253_v34, %v672_v40  ;;  %v291_v37 = vld [vmem:[#allocation5 + $0x58] sm:$0xff] }
  0x73   :  { %349 = vst [vmem:[#allocation8 + $0x28] sm:$0xff] %v333_v33  ;;  %v334_v31 = vadd.f32 %v318_v4, %v302_v24  ;;  %v335_v32 = vadd.f32 %v319_v14, %v303_v27  ;;  %v254_v46 = vsub.f32 1.0, %v397_v38 }
  0x74   :  { %v304_v28 = vmul.f32 %v288_v29, %v272_v30  ;;  %v305_v43 = vmul.f32 %v289_v44, %v273_v7  ;;  %v221_v12 = vadd.f32 %v220_v8, %v219_v20  ;;  %v274_v39 = vadd.f32 %v261_v36, %v680_v50 }
  0x75   :  { %350 = vst [vmem:[#allocation8 + $0x30] sm:$0xff] %v334_v31  ;;  %351 = vst [vmem:[#allocation8 + $0x38] sm:$0xff] %v335_v32  ;;  %v275_v54 = vadd.f32 %v261_v36, %v684_v19  ;;  %v262_v49 = vmul.f32 %v254_v46, %v686_v58 }
  0x76   :  { %v336_v53 = vadd.f32 %v320_v35, %v304_v28  ;;  %v337_v13 = vadd.f32 %v321_v42, %v305_v43  ;;  %v222_v47 = vrot.slane %v221_v12, 1  ;;  %v306_v48 = vmul.f32 %v290_v52, %v274_v39 }
  0x77   :  { %v307_v40 = vmul.f32 %v291_v37, %v275_v54  ;;  %v276_v60 = vadd.f32 %v262_v49, %v694_v26  ;;  %v277_v50 = vadd.f32 %v262_v49, %v698_v11  ;;  %v295_v26 = vld [vmem:[#allocation5 + $0x78] sm:$0xff] }
  0x78   :  { %352 = vst [vmem:[#allocation8 + $0x40] sm:$0xff] %v336_v53  ;;  %353 = vst [vmem:[#allocation8 + $0x48] sm:$0xff] %v337_v13  ;;  %v223_v18 = vadd.f32 %v222_v47, %v221_v12  ;;  %v338_v55 = vadd.f32 %v322_v41, %v306_v48 }
  0x79   :  { %v339_v56 = vadd.f32 %v323_v45, %v307_v40  ;;  %v308_v61 = vmul.f32 %v292_v57, %v276_v60  ;;  %v309_v0 = vmul.f32 %v293_v59, %v277_v50 }
  0x7a   :  { %v231_v19 = vmul.f32 0.06666667, %v223_v18  ;;  %354 = vst [vmem:[#allocation8 + $0x50] sm:$0xff] %v338_v55 }
  0x7b   :  { %355 = vst [vmem:[#allocation8 + $0x58] sm:$0xff] %v339_v56  ;;  %v340_v1 = vadd.f32 %v324_v62, %v308_v61  ;;  %v341_v51 = vadd.f32 %v325_v63, %v309_v0 }
  0x7c   :  { %398 = vrsqrt.f32 %v231_v19 }
  0x7d   :  { %356 = vst [vmem:[#allocation8 + $0x60] sm:$0xff] %v340_v1  ;;  %357 = vst [vmem:[#allocation8 + $0x68] sm:$0xff] %v341_v51 }
  0x86   :  { %v399_v58 = vpop.eup %398 }
  0x87   :  { %v255_v2 = vsub.f32 1.0, %v399_v58 }
  0x89   :  { %v263_v25 = vmul.f32 %v255_v2, %v706_v10 }
  0x8b   :  { %v278_v11 = vadd.f32 %v263_v25, %v711_v22  ;;  %v279_v6 = vadd.f32 %v263_v25, %v715_v23 }
  0x8d   :  { %v310_v3 = vmul.f32 %v294_v5, %v278_v11  ;;  %v311_v16 = vmul.f32 %v295_v26, %v279_v6 }
  0x8f   :  { %v342_v4 = vadd.f32 %v326_v9, %v310_v3  ;;  %v343_v14 = vadd.f32 %v327_v15, %v311_v16 }
  0x91   :  { %358 = vst [vmem:[#allocation8 + $0x70] sm:$0xff] %v342_v4  ;;  %359 = vst [vmem:[#allocation8 + $0x78] sm:$0xff] %v343_v14 }
  0x92   :  { %477 = shalt.err (!%p474_p0)
}
  0x93   :  { %s478_s27 = scalar_lea.hbm %s762_s3, 2048 }
  0x94   :  { %p479_p1 = scmp.ne.s32.totalorder %s762_s3, %s478_s27  ;;  %p482_p2 = scmp.lt.u32.totalorder %s478_s27, %s762_s3 }
  0x96   :  { %p484_p3 = pnand %p482_p2, %p479_p1 }
  0x98   :  { %487 = shalt.err (!%p484_p3)
}
  0x99   :  { %371 = dma.vmem_to_hbm [thread:$0]  %s366_s21, 2048, %s762_s3, [#allocation4], %s496_s24, %s496_s24, %s497_s25  }
  0x9a   :  { %492 = dma.done.wait [#allocation4], 2048  }
  0x9b   :  { %493 = vsyncadd [#allocation4], 4294965248 }
  0x9c   :  { %375 = vsyncpa [#allocation3], 1 }
  0x9d   :  { %376 = vsyncpa [#allocation6], 1 }
  0x9e   :  { %377 = vsyncpa [#allocation4], 1 }

</bundles_post_ra>
